<compile_context>
chip_gen: v5e
topology: v5e:2x2
jax: 0.10.0
libtpu: 0.0.40
codegen_flags: <defaults>
</compile_context>

<pallas_src>
import functools

import jax
import jax.numpy as jnp
from jax.experimental import pallas as pl
from jax.experimental.pallas import tpu as pltpu


# ----------------------------- small helpers -------------------------------

def _round_up(x: int, m: int) -> int:
    return ((x + m - 1) // m) * m


# ----------------------------- parameter init ------------------------------

def _standardize(w):
    """Var(W)=1, E[W]=0 per output row (matches torch _standardize for 2-D)."""
    mean = jnp.mean(w, axis=1, keepdims=True)
    var = jnp.var(w, axis=1, ddof=1, keepdims=True)   # unbiased
    return (w - mean) / jnp.sqrt(var + 1e-6)


def he_orthogonal_init(key, out_features, in_features):
    """Deterministic JAX re-implementation of he_orthogonal_init (2-D case)."""
    a = jax.random.normal(key, (max(out_features, in_features),
                                min(out_features, in_features)),
                          dtype=jnp.float32)
    q, r = jnp.linalg.qr(a)
    d = jnp.sign(jnp.diagonal(r))
    d = jnp.where(d == 0, 1.0, d)                      # guard zero diagonal
    q = q * d[None, :]                                 # make decomposition unique
    w = q if out_features >= in_features else q.T      # (out, in)
    w = w[:out_features, :in_features]
    w = _standardize(w)
    w = w * (1.0 / in_features) ** 0.5                 # fan_in = in_features
    return w


# --------------------------- one-time param packing -------------------------

def prepare_dense_params(weight, bias=None, compute_dtype=jnp.bfloat16):
    """Module-init packing: W (out,in) -> (K_pad, N_pad) compute_dtype,
    bias -> (1, N_pad) f32.  Done once, not per forward call."""
    out_features, in_features = weight.shape
    k_p = _round_up(in_features, 128)
    n_p = _round_up(out_features, 128)

    w_kn = weight.T.astype(compute_dtype)              # (K, N)
    if (k_p, n_p) != (in_features, out_features):
        w_kn = jnp.pad(w_kn, ((0, k_p - in_features), (0, n_p - out_features)))

    if bias is None:
        b_p = jnp.zeros((1, n_p), jnp.float32)
    else:
        b_p = bias.reshape(1, out_features).astype(jnp.float32)
        if n_p != out_features:
            b_p = jnp.pad(b_p, ((0, 0), (0, n_p - out_features)))
    return w_kn, b_p, out_features, in_features


# ------------------------------- Pallas kernel -----------------------------

def _dense_kernel(x_ref, w_ref, b_ref, o_ref, acc_ref, *,
                  use_activation, compute_dtype):
    # x_ref: (tm, tk) native dtype, w_ref: (tk, tn) compute_dtype,
    # b_ref: (1, tn) f32, o_ref: (tm, tn) out dtype, acc_ref: (tm, tn) f32.
    k = pl.program_id(2)

    x = x_ref[...].astype(compute_dtype)               # cast in-kernel (no HBM pass)
    part = jnp.dot(x, w_ref[...], preferred_element_type=jnp.float32)

    @pl.when(k == 0)
    def _first():
        acc_ref[...] = part                            # skip zero-fill + re-read

    @pl.when(k > 0)
    def _accum():
        acc_ref[...] += part

    @pl.when(k == pl.num_programs(2) - 1)
    def _finalize():
        y = acc_ref[...] + b_ref[...]
        if use_activation:
            # ScaledSiLU: silu(y) * (1 / 0.6); sigmoid runs on the EUP.
            y = y * jax.nn.sigmoid(y) * (1.0 / 0.6)
        o_ref[...] = y.astype(o_ref.dtype)


# ------------------------------- tile selection -----------------------------

def _pick_m_tile(m):
    m8 = _round_up(m, 8)
    if m8 <= 512:
        return m8                                      # single M block
    # adaptive: minimize padding, prefer bigger tiles on ties
    cands = (512, 448, 384, 320, 256, 192, 128)
    return min(cands, key=lambda t: (_round_up(m, t) - m, -t))


def _pick_divisor_tile(dim_p, cap):
    """Largest multiple of 128 <= cap that divides dim_p (dim_p is a 128-mult)."""
    if dim_p <= cap:
        return dim_p
    for t in range(cap, 127, -128):
        if dim_p % t == 0:
            return t
    return 128


# ------------------------------- forward wrapper ----------------------------

def dense_forward(x, w_kn, b_p, out_features, in_features, activation="silu", *,
                  max_tn=2048, max_tk=512, compute_dtype=jnp.bfloat16):
    """Pallas equivalent of Dense.forward.

    x:     (..., in_features) in its native dtype (no wrapper cast).
    w_kn:  (K_pad, N_pad) compute_dtype  -- from prepare_dense_params.
    b_p:   (1, N_pad) f32                -- from prepare_dense_params.
    """
    assert x.shape[-1] == in_features
    if activation is None:
        use_act = False
    elif isinstance(activation, str) and activation.lower() in ("silu", "swish"):
        use_act = True
    else:
        raise NotImplementedError(
            "Activation function not implemented for GemNet (yet).")

    lead_shape = x.shape[:-1]
    out_dtype = x.dtype
    k_p, n_p = w_kn.shape

    x2d = x.reshape(-1, in_features)
    m = x2d.shape[0]

    # ---- tile sizes (obey (8,128) tiling; divisors of padded dims) ----
    tm_e = _pick_m_tile(m)
    m_p = _round_up(m, tm_e)
    tn_e = _pick_divisor_tile(n_p, max_tn)             # full-N when n_p <= max_tn
    tk_e = _pick_divisor_tile(k_p, max_tk)

    # ---- x: pad only when actually misaligned, keep native dtype ----
    if (m_p, k_p) != (m, in_features):
        x2d = jnp.pad(x2d, ((0, m_p - m), (0, k_p - in_features)))

    kernel = functools.partial(_dense_kernel, use_activation=use_act,
                               compute_dtype=compute_dtype)

    grid_m, grid_n, grid_k = m_p // tm_e, n_p // tn_e, k_p // tk_e

    itemsize_x = jnp.dtype(x.dtype).itemsize
    itemsize_w = jnp.dtype(compute_dtype).itemsize
    itemsize_o = jnp.dtype(out_dtype).itemsize

    cost = pl.CostEstimate(
        flops=2 * m_p * k_p * n_p,
        transcendentals=m_p * n_p if use_act else 0,
        bytes_accessed=(m_p * k_p * itemsize_x * grid_n       # x panel re-reads
                        + k_p * n_p * itemsize_w * grid_m     # W panel re-reads
                        + n_p * 4 * grid_m
                        + m_p * n_p * itemsize_o),
    )

    # double-buffered VMEM footprint, capped at 48 MiB (v7x has 64 MiB/TC)
    vmem_est = (2 * tm_e * tk_e * itemsize_x
                + 2 * tk_e * tn_e * itemsize_w
                + 2 * tn_e * 4
                + tm_e * tn_e * 4
                + 2 * tm_e * tn_e * itemsize_o)
    vmem_limit = int(min(max(32 * 1024 * 1024, int(vmem_est * 1.5)),
                         48 * 1024 * 1024))

    out_p = pl.pallas_call(
        kernel,
        out_shape=jax.ShapeDtypeStruct((m_p, n_p), out_dtype),
        grid_spec=pltpu.PrefetchScalarGridSpec(
            num_scalar_prefetch=0,
            grid=(grid_m, grid_n, grid_k),
            in_specs=[
                pl.BlockSpec((tm_e, tk_e), lambda i, j, k: (i, k)),
                pl.BlockSpec((tk_e, tn_e), lambda i, j, k: (k, j)),
                pl.BlockSpec((1, tn_e), lambda i, j, k: (0, j)),
            ],
            out_specs=pl.BlockSpec((tm_e, tn_e), lambda i, j, k: (i, j)),
            scratch_shapes=[pltpu.VMEM((tm_e, tn_e), jnp.float32)],
        ),
        compiler_params=pltpu.CompilerParams(
            dimension_semantics=("parallel", "parallel", "arbitrary"),
            vmem_limit_bytes=vmem_limit,
        ),
        cost_estimate=cost,
    )(x2d, w_kn, b_p)

    out2d = out_p[:m, :out_features]
    return out2d.reshape(*lead_shape, out_features)


def dense_apply(x, weight, bias=None, activation="silu",
                compute_dtype=jnp.bfloat16):
    """Convenience: pack params then run.  In a real module, call
    prepare_dense_params once at init and reuse the packed weights."""
    w_kn, b_p, out_f, in_f = prepare_dense_params(weight, bias, compute_dtype)
    return dense_forward(x, w_kn, b_p, out_f, in_f, activation,
                         compute_dtype=compute_dtype)


# ----------------------------------- demo ----------------------------------

if __name__ == "__main__":
    key = jax.random.PRNGKey(0)
    k_x, k_w = jax.random.split(key)

    batch, seq, in_features, out_features = 2, 8, 32, 32
    x = jax.random.normal(k_x, (batch, seq, in_features), dtype=jnp.float32)

    # Dense(in_features, out_features, bias=False, activation="silu")
    weight = he_orthogonal_init(k_w, out_features, in_features)

    # one-time packing (module init), then forward
    w_kn, b_p, out_f, in_f = prepare_dense_params(weight, bias=None)
    out = dense_forward(x, w_kn, b_p, out_f, in_f, activation="silu")
    out = jax.block_until_ready(out)

    # reference check in plain JAX (match the kernel's bf16 operand rounding,
    # f32 accumulation + f32 epilogue)
    xb = x.astype(jnp.bfloat16).astype(jnp.float32)
    wb = weight.astype(jnp.bfloat16).astype(jnp.float32)
    ref = xb.reshape(-1, in_features) @ wb.T
    ref = ref * jax.nn.sigmoid(ref) * (1.0 / 0.6)
    ref = ref.reshape(batch, seq, out_features)
    assert jnp.allclose(out, ref, atol=1e-3, rtol=1e-3), "mismatch vs reference"

    print("KERNEL_OK")
</pallas_src>

<mosaic_0001>
module attributes {stable_mosaic.version = 11 : i64} {
  func.func @_dense_kernel(%arg0: i32, %arg1: i32, %arg2: i32, %arg3: memref<16x128xf32, #tpu.memory_space<vmem>>, %arg4: memref<128x128xbf16, #tpu.memory_space<vmem>>, %arg5: memref<1x128xf32, #tpu.memory_space<vmem>>, %arg6: memref<16x128xf32, #tpu.memory_space<vmem>>, %arg7: memref<16x128xf32, #tpu.memory_space<vmem>>) attributes {dimension_semantics = [#tpu.dimension_semantics<parallel>, #tpu.dimension_semantics<parallel>, #tpu.dimension_semantics<arbitrary>], iteration_bounds = array<i64: 1, 1, 1>, scalar_prefetch = 0 : i64, scratch_operands = 1 : i64, tpu.core_type = #tpu.core_type<tc>, window_params = [{transform_indices = @transform_0, window_bounds = array<i64: 16, 128>}, {transform_indices = @transform_1, window_bounds = array<i64: 128, 128>}, {transform_indices = @transform_2, window_bounds = array<i64: 1, 128>}, {transform_indices = @transform_3, window_bounds = array<i64: 16, 128>}]} {
    %c0 = arith.constant 0 : index
    %c0_0 = arith.constant 0 : index
    %0 = vector.load %arg3[%c0, %c0_0] : memref<16x128xf32, #tpu.memory_space<vmem>>, vector<16x128xf32>
    %1 = arith.truncf %0 : vector<16x128xf32> to vector<16x128xbf16>
    %c0_1 = arith.constant 0 : index
    %c0_2 = arith.constant 0 : index
    %2 = vector.load %arg4[%c0_1, %c0_2] : memref<128x128xbf16, #tpu.memory_space<vmem>>, vector<128x128xbf16>
    %cst = arith.constant dense<0.000000e+00> : vector<16x128xf32>
    %3 = tpu.matmul %1, %2, %cst {dimension_numbers = #tpu.dot_dimension_numbers<[1], [0], [0], [1], [0, 0, 1, 1], [], []>} : vector<16x128xbf16>, vector<128x128xbf16>, vector<16x128xf32> -> vector<16x128xf32>
    %c0_i32 = arith.constant 0 : i32
    %4 = arith.cmpi eq, %arg2, %c0_i32 : i32
    %5 = arith.extui %4 : i1 to i32
    %c0_i32_3 = arith.constant 0 : i32
    %6 = arith.cmpi ne, %5, %c0_i32_3 : i32
    scf.if %6 {
      %c0_8 = arith.constant 0 : index
      %c0_9 = arith.constant 0 : index
      %13 = vector.load %arg7[%c0_8, %c0_9] : memref<16x128xf32, #tpu.memory_space<vmem>>, vector<16x128xf32>
      tpu.vector_store %arg7[%c0_8, %c0_9], %3 {strides = array<i32>} : memref<16x128xf32, #tpu.memory_space<vmem>>, vector<16x128xf32>,
    } else {
    }
    %c0_i32_4 = arith.constant 0 : i32
    %7 = arith.cmpi sgt, %arg2, %c0_i32_4 : i32
    %8 = arith.extui %7 : i1 to i32
    %c0_i32_5 = arith.constant 0 : i32
    %9 = arith.cmpi ne, %8, %c0_i32_5 : i32
    scf.if %9 {
      %c0_8 = arith.constant 0 : index
      %c0_9 = arith.constant 0 : index
      %13 = vector.load %arg7[%c0_8, %c0_9] : memref<16x128xf32, #tpu.memory_space<vmem>>, vector<16x128xf32>
      %14 = arith.addf %13, %3 : vector<16x128xf32>
      %c0_10 = arith.constant 0 : index
      %c0_11 = arith.constant 0 : index
      %15 = vector.load %arg7[%c0_10, %c0_11] : memref<16x128xf32, #tpu.memory_space<vmem>>, vector<16x128xf32>
      tpu.vector_store %arg7[%c0_10, %c0_11], %14 {strides = array<i32>} : memref<16x128xf32, #tpu.memory_space<vmem>>, vector<16x128xf32>,
    } else {
    }
    %c0_i32_6 = arith.constant 0 : i32
    %10 = arith.cmpi eq, %arg2, %c0_i32_6 : i32
    %11 = arith.extui %10 : i1 to i32
    %c0_i32_7 = arith.constant 0 : i32
    %12 = arith.cmpi ne, %11, %c0_i32_7 : i32
    scf.if %12 {
      %c0_8 = arith.constant 0 : index
      %c0_9 = arith.constant 0 : index
      %13 = vector.load %arg7[%c0_8, %c0_9] : memref<16x128xf32, #tpu.memory_space<vmem>>, vector<16x128xf32>
      %c0_10 = arith.constant 0 : index
      %c0_11 = arith.constant 0 : index
      %14 = vector.load %arg5[%c0_10, %c0_11] : memref<1x128xf32, #tpu.memory_space<vmem>>, vector<1x128xf32>
      %15 = vector.broadcast %14 : vector<1x128xf32> to vector<16x128xf32>
      %16 = arith.addf %13, %15 : vector<16x128xf32>
      %17 = arith.negf %16 : vector<16x128xf32>
      %18 = math.exp %17 : vector<16x128xf32>
      %cst_12 = arith.constant 1.000000e+00 : f32
      %19 = vector.broadcast %cst_12 : f32 to vector<16x128xf32>
      %20 = arith.addf %19, %18 : vector<16x128xf32>
      %21 = arith.divf %19, %20 : vector<16x128xf32>
      %22 = arith.mulf %16, %21 : vector<16x128xf32>
      %cst_13 = arith.constant 1.66666663 : f32
      %23 = vector.broadcast %cst_13 : f32 to vector<16x128xf32>
      %24 = arith.mulf %22, %23 : vector<16x128xf32>
      %c0_14 = arith.constant 0 : index
      %c0_15 = arith.constant 0 : index
      %25 = vector.load %arg6[%c0_14, %c0_15] : memref<16x128xf32, #tpu.memory_space<vmem>>, vector<16x128xf32>
      tpu.vector_store %arg6[%c0_14, %c0_15], %24 {strides = array<i32>} : memref<16x128xf32, #tpu.memory_space<vmem>>, vector<16x128xf32>,
    } else {
    }
    return
  }
  func.func @transform_0(%arg0: i32, %arg1: i32, %arg2: i32) -> (i32, i32) {
    %c0_i32 = arith.constant 0 : i32
    return %arg0, %arg2 : i32, i32
  }
  func.func @transform_1(%arg0: i32, %arg1: i32, %arg2: i32) -> (i32, i32) {
    %c0_i32 = arith.constant 0 : i32
    return %arg2, %arg1 : i32, i32
  }
  func.func @transform_2(%arg0: i32, %arg1: i32, %arg2: i32) -> (i32, i32) {
    %c0_i32 = arith.constant 0 : i32
    %c0_i32_0 = arith.constant 0 : i32
    return %c0_i32, %arg1 : i32, i32
  }
  func.func @transform_3(%arg0: i32, %arg1: i32, %arg2: i32) -> (i32, i32) {
    %c0_i32 = arith.constant 0 : i32
    return %arg0, %arg1 : i32, i32
  }
}

</mosaic_0001>

<bundles_post_ra>
// kernel: tpu_custom_call.1
= control target key start
LH: loop header
LB: loop body
LE: loop exit
PB: predicated region body
PF: predicated region fallthrough
CT: control target
= control target key end

     0   :  { %8 = vsyncpa [#allocation4], 0  ;;  %s400_s0 = inlined_call_operand.hbm [shape: f32[16,128], index: 0, kind: input, shape index: {}]   ;;  %s401_s1 = inlined_call_operand.hbm [shape: bf16[128,128], index: 1, kind: input, shape index: {}]   ;;  %s402_s2 = inlined_call_operand.vmem [shape: f32[1,128], index: 2, kind: input, shape index: {}]   ;;  %s403_s3 = inlined_call_operand.hbm [shape: f32[16,128], index: 3, kind: output, shape index: {}]  }
   0x1   :  { %9 = vsyncpa [#allocation7], 0 }
   0x2   :  { %10 = vsyncpa [#allocation5], 0  ;;  %s15_s14 = sshll.u32 %s400_s0, 4  ;;  %s355_s15 = smov [#allocation3]   ;;  %s16_s14 = int_to_ptr.hbm [resolvable:$true] %s15_s14 }
   0x3   :  { %s17_s16 = sshll.u32 %s355_s15, 4  ;;  %s28_s19 = sshll.u32 %s401_s1, 4  ;;  %s18_s16 = int_to_ptr.vmem [resolvable:$true] %s17_s16  ;;  %s29_s19 = int_to_ptr.hbm [resolvable:$true] %s28_s19 }
   0x4   :  { %s356_s20 = smov 128   ;;  %s357_s21 = smov 8  }
   0x5   :  { %23 = dma.hbm_to_vmem [thread:$0]  %s16_s14, 256, %s18_s16, [#allocation4], %s356_s20, %s356_s20, %s357_s21  }
   0x6   :  { %s358_s22 = smov [#allocation6]   ;;  %s359_s24 = smov 64  }
   0x7   :  { %s30_s23 = sshll.u32 %s358_s22, 4  ;;  %s360_s0 = smov 4   ;;  %s31_s23 = int_to_ptr.vmem [resolvable:$true] %s30_s23 }
   0x8   :  { %36 = dma.hbm_to_vmem [thread:$0]  %s29_s19, 1024, %s31_s23, [#allocation7], %s359_s24, %s359_s24, %s360_s0  }
   0x9   :  { %349 = dma.done.wait [#allocation4], 256  }
   0xa   :  { %350 = vsyncadd [#allocation4], 4294967040 }
   0xb   :  { %351 = dma.done.wait [#allocation7], 1024  }
   0xc   :  { %352 = vsyncadd [#allocation7], 4294966272  ;;  %v260_v0 = vld [vmem:[#allocation6 + $0x38] sm:$0xff]  ;;  %v259_v1 = vld [vmem:[#allocation6 + $0x30] sm:$0xff]  ;;  %s205_s29 = sshll.u32 %s403_s3, 4  ;;  %s206_s29 = int_to_ptr.hbm [resolvable:$true] %s205_s29 }
   0xd   :  { %114 = vmatpush.bf16.msra.mxu0 %v260_v0  ;;  %v258_v2 = vld [vmem:[#allocation6 + $0x28] sm:$0xff]  ;;  %v257_v3 = vld [vmem:[#allocation6 + $0x20] sm:$0xff]  ;;  %v256_v4 = vld [vmem:[#allocation6 + $0x18] sm:$0xff] }
   0xe   :  { %v255_v5 = vld [vmem:[#allocation6 + $0x10] sm:$0xff]  ;;  %v254_v6 = vld [vmem:[#allocation6 + $0x8] sm:$0xff]  ;;  %v253_v7 = vld [vmem:[#allocation6] sm:$0xff] }
   0xf   :  { %v47_v8 = vld [vmem:[#allocation3] sm:$0xff]  ;;  %v48_v9 = vld [vmem:[#allocation3 + $0x8] sm:$0xff] }
  0x10   :  { %v49_v10 = vpack.c.bf16 %v48_v9, %v47_v8  ;;  %v268_v11 = vld [vmem:[%s402_s2] ss:$0 sm:$0xff]  ;;  %s361_s2 = smov [#allocation8]  }
  0x11   :  { %115 = vmatpush.bf16.msra.mxu0 %v259_v1  ;;  %s203_s26 = sshll.u32 %s361_s2, 4  ;;  %s204_s26 = int_to_ptr.vmem [resolvable:$true] %s203_s26 }
  0x15   :  { %116 = vmatpush.bf16.msra.mxu0 %v258_v2 }
  0x19   :  { %117 = vmatpush.bf16.msra.mxu0 %v257_v3 }
  0x1d   :  { %118 = vmatpush.bf16.msra.mxu0 %v256_v4 }
  0x21   :  { %119 = vmatpush.bf16.msra.mxu0 %v255_v5 }
  0x25   :  { %120 = vmatpush.bf16.msra.mxu0 %v254_v6 }
  0x29   :  { %121 = vmatpush.bf16.msra.mxu0 %v253_v7 }
  0x2c   :  { %122 = vmatmul.bf16.vlgmr.msra.gmra.mxu0 %v49_v10 }
  0xa9   :  { %v123_v12 = vpop.f32.mrf.mxu0 }
  0xaa   :  { %v153_v13 = vadd.f32 %v268_v11, %v123_v12 }
  0xac   :  { %v251_v14 = vmul.f32 -1.442695, %v153_v13 }
  0xae   :  { %269 = vpow2.f32 %v251_v14 }
  0xb1   :  { %v125_v15 = vpop.f32.mrf.mxu0 }
  0xb2   :  { %v154_v16 = vadd.f32 %v268_v11, %v125_v15 }
  0xb4   :  { %v270_v17 = vpop.eup %269  ;;  %v252_v18 = vmul.f32 -1.442695, %v154_v16 }
  0xb5   :  { %v161_v19 = vadd.f32 1.0, %v270_v17 }
  0xb6   :  { %271 = vpow2.f32 %v252_v18 }
  0xb7   :  { %273 = vrcp.f32 %v161_v19  ;;  %v174_v25 = vand.u32 2147483648, %v161_v19  ;;  %v172_v27 = vand.u32 2147483647, %v161_v19  ;;  %vm168_vm1 = vweird.f32 %v161_v19 }
  0xb9   :  { %v175_v30 = vor.u32 1.1754944e-38, %v174_v25  ;;  %vm173_vm3 = vcmp.eq.f32.partialorder %v172_v27, 8.507059e+37 }
  0xbc   :  { %v272_v20 = vpop.eup %271 }
  0xbd   :  { %v274_v21 = vpop.eup %273  ;;  %v162_v22 = vadd.f32 1.0, %v272_v20 }
  0xbe   :  { %v164_v23 = vmul.f32 %v274_v21, %v161_v19  ;;  %vm169_vm0 = vweird.f32 %v274_v21 }
  0xbf   :  { %275 = vrcp.f32 %v162_v22  ;;  %vm170_vm2 = vmor %vm168_vm1, %vm169_vm0  ;;  %v189_v36 = vand.u32 2147483648, %v162_v22  ;;  %v187_v39 = vand.u32 2147483647, %v162_v22  ;;  %vm183_vm5 = vweird.f32 %v162_v22 }
  0xc0   :  { %v165_v24 = vsub.f32 1.0, %v164_v23 }
  0xc1   :  { %v190_v41 = vor.u32 1.1754944e-38, %v189_v36  ;;  %vm188_vm7 = vcmp.eq.f32.partialorder %v187_v39, 8.507059e+37 }
  0xc2   :  { %v166_v26 = vmul.f32 %v274_v21, %v165_v24 }
  0xc4   :  { %v167_v28 = vadd.f32 %v274_v21, %v166_v26 }
  0xc5   :  { %v276_v29 = vpop.eup %275 }
  0xc6   :  { %v171_v31 = vsel %vm170_vm2, %v274_v21, %v167_v28  ;;  %v179_v32 = vmul.f32 %v276_v29, %v162_v22  ;;  %vm184_vm4 = vweird.f32 %v276_v29 }
  0xc7   :  { %v176_v33 = vsel %vm173_vm3, %v175_v30, %v171_v31  ;;  %vm185_vm6 = vmor %vm183_vm5, %vm184_vm4 }
  0xc8   :  { %v193_v34 = vmul.f32 %v176_v33, %v153_v13  ;;  %v180_v35 = vsub.f32 1.0, %v179_v32 }
  0xca   :  { %v195_v37 = vmul.f32 1.6666666, %v193_v34  ;;  %v181_v38 = vmul.f32 %v276_v29, %v180_v35 }
  0xcc   :  { %197 = vst [vmem:[#allocation8] sm:$0xff] %v195_v37  ;;  %v182_v40 = vadd.f32 %v276_v29, %v181_v38 }
  0xce   :  { %v186_v42 = vsel %vm185_vm6, %v276_v29, %v182_v40 }
  0xcf   :  { %v191_v43 = vsel %vm188_vm7, %v190_v41, %v186_v42 }
  0xd0   :  { %v194_v44 = vmul.f32 %v191_v43, %v154_v16 }
  0xd2   :  { %v196_v45 = vmul.f32 1.6666666, %v194_v44 }
  0xd4   :  { %198 = vst [vmem:[#allocation8 + $0x8] sm:$0xff] %v196_v45 }
  0xd5   :  { %211 = dma.vmem_to_hbm [thread:$0]  %s204_s26, 256, %s206_s29, [#allocation5], %s356_s20, %s356_s20, %s357_s21  }
  0xd6   :  { %353 = dma.done.wait [#allocation5], 256  }
  0xd7   :  { %354 = vsyncadd [#allocation5], 4294967040 }
  0xd8   :  { %216 = vsyncpa [#allocation4], 1 }
  0xd9   :  { %217 = vsyncpa [#allocation7], 1 }
  0xda   :  { %218 = vsyncpa [#allocation5], 1 }

</bundles_post_ra>
